<compile_context>
chip_gen: v5e
topology: v5e:2x2
jax: 0.10.0
libtpu: 0.0.40
codegen_flags: <defaults>
</compile_context>

<pallas_src>
import functools

import jax
import jax.numpy as jnp
from jax.experimental import pallas as pl
from jax.experimental.pallas import tpu as pltpu


def _shr(v, k):
    return jax.lax.shift_right_logical(v, jnp.uint32(k))


def _lbrd_kernel(x_ref, w_ref, b_ref, g_ref, be_ref, o_ref, acc_ref, *,
                 eps, p_drop, apply_dropout, seed, tn, d_total):
    j = pl.program_id(0)          # output-feature tile
    k = pl.program_id(1)          # contraction tile
    n_k = pl.num_programs(1)

    # ---- Linear (MXU): accumulate x(:, k-tile) @ W(j-tile, k-tile)^T.
    @pl.when(k == 0)
    def _():
        acc_ref[...] = jnp.zeros_like(acc_ref)

    acc_ref[...] += jax.lax.dot_general(
        x_ref[...], w_ref[...],
        dimension_numbers=(((1,), (1,)), ((), ())),
        preferred_element_type=jnp.float32)                  # (N, tn)

    # ---- Epilogue: bias + BatchNorm1d(train) + ReLU + inverted Dropout.
    @pl.when(k == n_k - 1)
    def _():
        h = acc_ref[...] + b_ref[...]                        # (N, tn)
        n_rows = h.shape[0]
        inv_n = 1.0 / float(n_rows)
        mean = jnp.sum(h, axis=0, keepdims=True) * inv_n     # (1, tn)
        ex2 = jnp.sum(h * h, axis=0, keepdims=True) * inv_n  # (1, tn)
        var = ex2 - mean * mean                              # biased variance
        inv_std = jax.lax.rsqrt(var + eps)

        # Fold gamma, beta, mean and the inverted-dropout scale into one
        # per-feature affine; ReLU commutes with the positive scale.
        inv_keep = (1.0 / (1.0 - p_drop)) if apply_dropout else 1.0
        scale = g_ref[...] * inv_std * inv_keep               # (1, tn)
        shift = (be_ref[...] - mean * g_ref[...] * inv_std) * inv_keep

        out = jnp.maximum(h * scale + shift, 0.0)             # BN + ReLU (+scale)

        if apply_dropout:
            # Counter-hash PRNG keyed on (seed, global element index):
            # tiling-invariant and fully portable (plain uint32 VPU ops).
            rows = jax.lax.broadcasted_iota(jnp.int32, out.shape, 0)
            cols = jax.lax.broadcasted_iota(jnp.int32, out.shape, 1) + j * tn
            bits = (rows * d_total + cols).astype(jnp.uint32)
            bits = bits ^ jnp.uint32(seed & 0xFFFFFFFF)
            bits = bits ^ _shr(bits, 16)
            bits = bits * jnp.uint32(0x85EBCA6B)
            bits = bits ^ _shr(bits, 13)
            bits = bits * jnp.uint32(0xC2B2AE35)
            bits = bits ^ _shr(bits, 16)
            thresh = jnp.uint32(min(int(p_drop * 4294967296.0), 0xFFFFFFFF))
            out = jnp.where(bits >= thresh, out, 0.0)

        o_ref[...] = out.astype(o_ref.dtype)


def _pick_feature_tile(d):
    # Lane-dense, MXU-aligned output tile; fall back to full D for odd sizes.
    for cand in (512, 256, 128):
        if d % cand == 0:
            return cand
    return d


def _pick_contract_tile(d, n, tn, budget_bytes=20 * 1024 * 1024):
    # Largest MXU-aligned contraction tile whose double-buffered footprint fits.
    if d % 128 != 0:
        return d
    fp32 = 4
    cands = [d] + [c for c in (4096, 2048, 1024, 512, 256, 128)
                   if c < d and d % c == 0]
    for cand in cands:
        foot = (2 * n * cand + 2 * tn * cand + 3 * n * tn + 6 * tn) * fp32
        if foot <= budget_bytes:
            return cand
    return cands[-1]


def lbrd_forward(x, weight, bias, gamma, beta, seed, *, eps=1e-5,
                 dropout=0.0, training=True, tn=None, tk=None):
    """x: (N, D) f32; weight: (D, D) in PyTorch (out, in) layout; bias/gamma/beta: (D,)."""
    n, d = x.shape
    d_out, d_in = weight.shape
    assert d_in == d and d_out == d

    apply_dropout = bool(training) and float(dropout) > 0.0
    if apply_dropout and float(dropout) >= 1.0:
        return jnp.zeros_like(x)             # everything dropped; avoid inf scale

    if tn is None:
        tn = _pick_feature_tile(d)
    if tk is None:
        tk = _pick_contract_tile(d, n, tn)
    assert d % tn == 0 and d % tk == 0
    grid = (d // tn, d // tk)

    b2 = bias.reshape(1, d)
    g2 = gamma.reshape(1, d)
    be2 = beta.reshape(1, d)

    kernel = functools.partial(
        _lbrd_kernel, eps=float(eps), p_drop=float(dropout),
        apply_dropout=apply_dropout, seed=int(seed), tn=int(tn),
        d_total=int(d))

    fp32 = 4
    footprint = (2 * n * tk + 2 * tn * tk + 2 * n * tn + n * tn + 6 * tn) * fp32
    vmem_limit = int(min(64 * 1024 * 1024, max(footprint + (8 << 20), 16 << 20)))

    cost = pl.CostEstimate(
        flops=2 * n * d * d,
        transcendentals=0,
        bytes_accessed=(2 * n * d + d * d + 3 * d) * fp32)

    return pl.pallas_call(
        kernel,
        out_shape=jax.ShapeDtypeStruct((n, d), x.dtype),
        grid=grid,
        in_specs=[
            pl.BlockSpec((n, tk), lambda j, k: (0, k)),    # x column block
            pl.BlockSpec((tn, tk), lambda j, k: (j, k)),   # W row/col tile (streamed)
            pl.BlockSpec((1, tn), lambda j, k: (0, j)),    # bias
            pl.BlockSpec((1, tn), lambda j, k: (0, j)),    # gamma
            pl.BlockSpec((1, tn), lambda j, k: (0, j)),    # beta
        ],
        out_specs=pl.BlockSpec((n, tn), lambda j, k: (0, j)),
        scratch_shapes=[pltpu.VMEM((n, tn), jnp.float32)],
        compiler_params=pltpu.CompilerParams(
            dimension_semantics=("parallel", "arbitrary"),
            vmem_limit_bytes=vmem_limit),
        cost_estimate=cost,
    )(x, weight, b2, g2, be2)


if __name__ == "__main__":
    N, D = 16, 256            # batch=16, d_model=256
    DROPOUT = 0.1
    BIAS = True

    key = jax.random.PRNGKey(0)
    kx, kw, kb = jax.random.split(key, 3)

    x = jax.random.normal(kx, (N, D), dtype=jnp.float32)

    # Parameter init with shapes matching nn.Linear(D, D, bias) + BatchNorm1d(D).
    bound = 1.0 / (D ** 0.5)
    weight = jax.random.uniform(kw, (D, D), minval=-bound, maxval=bound,
                                dtype=jnp.float32)            # (out, in)
    bias = (jax.random.uniform(kb, (D,), minval=-bound, maxval=bound,
                               dtype=jnp.float32) if BIAS
            else jnp.zeros((D,), jnp.float32))
    gamma = jnp.ones((D,), jnp.float32)     # BatchNorm1d weight init
    beta = jnp.zeros((D,), jnp.float32)     # BatchNorm1d bias init

    # Pure-JAX reference (dropout disabled).
    h_ref = x @ weight.T + bias
    mu = jnp.mean(h_ref, axis=0, keepdims=True)
    va = jnp.mean((h_ref - mu) ** 2, axis=0, keepdims=True)
    ref = jnp.maximum((h_ref - mu) * jax.lax.rsqrt(va + 1e-5) * gamma + beta, 0.0)

    # 1) Default tile selection.
    out_nodrop = lbrd_forward(x, weight, bias, gamma, beta, seed=1234,
                              eps=1e-5, dropout=0.0, training=True)
    assert jnp.allclose(out_nodrop, ref, atol=1e-3, rtol=1e-3)

    # 2) Forced multi-tile configuration (feature + contraction tiling active).
    out_tiled = lbrd_forward(x, weight, bias, gamma, beta, seed=1234,
                             eps=1e-5, dropout=0.0, training=True, tn=128, tk=128)
    assert jnp.allclose(out_tiled, ref, atol=1e-3, rtol=1e-3)

    # 3) Full training forward with dropout.
    out = lbrd_forward(x, weight, bias, gamma, beta, seed=1234,
                       eps=1e-5, dropout=DROPOUT, training=True)
    jax.block_until_ready(out)
    assert out.shape == (N, D) and out.dtype == jnp.float32
    # Kept entries must equal the no-dropout output scaled by 1/(1-p).
    keep_mask = out != 0.0
    scaled = out_nodrop / (1.0 - DROPOUT)
    assert jnp.allclose(jnp.where(keep_mask, out, 0.0),
                        jnp.where(keep_mask, scaled, 0.0),
                        atol=1e-3, rtol=1e-3)
    print("KERNEL_OK")
</pallas_src>

<mosaic_0001>
module attributes {stable_mosaic.version = 11 : i64} {
  func.func @_lbrd_kernel(%arg0: i32, %arg1: i32, %arg2: memref<16x256xf32, #tpu.memory_space<vmem>>, %arg3: memref<256x256xf32, #tpu.memory_space<vmem>>, %arg4: memref<1x256xf32, #tpu.memory_space<vmem>>, %arg5: memref<1x256xf32, #tpu.memory_space<vmem>>, %arg6: memref<1x256xf32, #tpu.memory_space<vmem>>, %arg7: memref<16x256xf32, #tpu.memory_space<vmem>>, %arg8: memref<16x256xf32, #tpu.memory_space<vmem>>) attributes {dimension_semantics = [#tpu.dimension_semantics<parallel>, #tpu.dimension_semantics<arbitrary>], iteration_bounds = array<i64: 1, 1>, scalar_prefetch = 0 : i64, scratch_operands = 1 : i64, tpu.core_type = #tpu.core_type<tc>, window_params = [{transform_indices = @transform_0, window_bounds = array<i64: 16, 256>}, {transform_indices = @transform_1, window_bounds = array<i64: 256, 256>}, {transform_indices = @transform_2, window_bounds = array<i64: 1, 256>}, {transform_indices = @transform_3, window_bounds = array<i64: 1, 256>}, {transform_indices = @transform_4, window_bounds = array<i64: 1, 256>}, {transform_indices = @transform_5, window_bounds = array<i64: 16, 256>}]} {
    %c0_i32 = arith.constant 0 : i32
    %0 = arith.cmpi eq, %arg1, %c0_i32 : i32
    %1 = arith.extui %0 : i1 to i32
    %c0_i32_0 = arith.constant 0 : i32
    %2 = arith.cmpi ne, %1, %c0_i32_0 : i32
    scf.if %2 {
      %cst_10 = arith.constant 0.000000e+00 : f32
      %12 = vector.broadcast %cst_10 : f32 to vector<16x256xf32>
      %c0_11 = arith.constant 0 : index
      %c0_12 = arith.constant 0 : index
      %13 = vector.load %arg8[%c0_11, %c0_12] : memref<16x256xf32, #tpu.memory_space<vmem>>, vector<16x256xf32>
      tpu.vector_store %arg8[%c0_11, %c0_12], %12 {strides = array<i32>} : memref<16x256xf32, #tpu.memory_space<vmem>>, vector<16x256xf32>,
    } else {
    }
    %c0 = arith.constant 0 : index
    %c0_1 = arith.constant 0 : index
    %3 = vector.load %arg8[%c0, %c0_1] : memref<16x256xf32, #tpu.memory_space<vmem>>, vector<16x256xf32>
    %c0_2 = arith.constant 0 : index
    %c0_3 = arith.constant 0 : index
    %4 = vector.load %arg2[%c0_2, %c0_3] : memref<16x256xf32, #tpu.memory_space<vmem>>, vector<16x256xf32>
    %c0_4 = arith.constant 0 : index
    %c0_5 = arith.constant 0 : index
    %5 = vector.load %arg3[%c0_4, %c0_5] : memref<256x256xf32, #tpu.memory_space<vmem>>, vector<256x256xf32>
    %cst = arith.constant dense<0.000000e+00> : vector<16x256xf32>
    %6 = tpu.matmul %4, %5, %cst {dimension_numbers = #tpu.dot_dimension_numbers<[1], [1], [0], [0], [0, 0, 1, 0], [], []>} : vector<16x256xf32>, vector<256x256xf32>, vector<16x256xf32> -> vector<16x256xf32>
    %7 = arith.addf %3, %6 : vector<16x256xf32>
    %c0_6 = arith.constant 0 : index
    %c0_7 = arith.constant 0 : index
    %8 = vector.load %arg8[%c0_6, %c0_7] : memref<16x256xf32, #tpu.memory_space<vmem>>, vector<16x256xf32>
    tpu.vector_store %arg8[%c0_6, %c0_7], %7 {strides = array<i32>} : memref<16x256xf32, #tpu.memory_space<vmem>>, vector<16x256xf32>,
    %c0_i32_8 = arith.constant 0 : i32
    %9 = arith.cmpi eq, %arg1, %c0_i32_8 : i32
    %10 = arith.extui %9 : i1 to i32
    %c0_i32_9 = arith.constant 0 : i32
    %11 = arith.cmpi ne, %10, %c0_i32_9 : i32
    scf.if %11 {
      %c0_10 = arith.constant 0 : index
      %c0_11 = arith.constant 0 : index
      %12 = vector.load %arg8[%c0_10, %c0_11] : memref<16x256xf32, #tpu.memory_space<vmem>>, vector<16x256xf32>
      %c0_12 = arith.constant 0 : index
      %c0_13 = arith.constant 0 : index
      %13 = vector.load %arg4[%c0_12, %c0_13] : memref<1x256xf32, #tpu.memory_space<vmem>>, vector<1x256xf32>
      %14 = vector.broadcast %13 : vector<1x256xf32> to vector<16x256xf32>
      %15 = arith.addf %12, %14 : vector<16x256xf32>
      %cst_14 = arith.constant dense<0.000000e+00> : vector<256xf32>
      %16 = vector.multi_reduction <add>, %15, %cst_14 [0] : vector<16x256xf32> to vector<256xf32>
      %17 = vector.shape_cast %16 : vector<256xf32> to vector<1x256xf32>
      %cst_15 = arith.constant 6.250000e-02 : f32
      %18 = vector.broadcast %cst_15 : f32 to vector<1x256xf32>
      %19 = arith.mulf %17, %18 : vector<1x256xf32>
      %20 = arith.mulf %15, %15 : vector<16x256xf32>
      %cst_16 = arith.constant dense<0.000000e+00> : vector<256xf32>
      %21 = vector.multi_reduction <add>, %20, %cst_16 [0] : vector<16x256xf32> to vector<256xf32>
      %22 = vector.shape_cast %21 : vector<256xf32> to vector<1x256xf32>
      %cst_17 = arith.constant 6.250000e-02 : f32
      %23 = vector.broadcast %cst_17 : f32 to vector<1x256xf32>
      %24 = arith.mulf %22, %23 : vector<1x256xf32>
      %25 = arith.mulf %19, %19 : vector<1x256xf32>
      %26 = arith.subf %24, %25 : vector<1x256xf32>
      %cst_18 = arith.constant 9.99999974E-6 : f32
      %27 = vector.broadcast %cst_18 : f32 to vector<1x256xf32>
      %28 = arith.addf %26, %27 : vector<1x256xf32>
      %29 = math.rsqrt %28 : vector<1x256xf32>
      %c0_19 = arith.constant 0 : index
      %c0_20 = arith.constant 0 : index
      %30 = vector.load %arg5[%c0_19, %c0_20] : memref<1x256xf32, #tpu.memory_space<vmem>>, vector<1x256xf32>
      %31 = arith.mulf %30, %29 : vector<1x256xf32>
      %cst_21 = arith.constant 1.000000e+00 : f32
      %32 = vector.broadcast %cst_21 : f32 to vector<1x256xf32>
      %33 = arith.mulf %31, %32 : vector<1x256xf32>
      %c0_22 = arith.constant 0 : index
      %c0_23 = arith.constant 0 : index
      %34 = vector.load %arg6[%c0_22, %c0_23] : memref<1x256xf32, #tpu.memory_space<vmem>>, vector<1x256xf32>
      %c0_24 = arith.constant 0 : index
      %c0_25 = arith.constant 0 : index
      %35 = vector.load %arg5[%c0_24, %c0_25] : memref<1x256xf32, #tpu.memory_space<vmem>>, vector<1x256xf32>
      %36 = arith.mulf %19, %35 : vector<1x256xf32>
      %37 = arith.mulf %36, %29 : vector<1x256xf32>
      %38 = arith.subf %34, %37 : vector<1x256xf32>
      %cst_26 = arith.constant 1.000000e+00 : f32
      %39 = vector.broadcast %cst_26 : f32 to vector<1x256xf32>
      %40 = arith.mulf %38, %39 : vector<1x256xf32>
      %41 = vector.broadcast %33 : vector<1x256xf32> to vector<16x256xf32>
      %42 = arith.mulf %15, %41 : vector<16x256xf32>
      %43 = vector.broadcast %40 : vector<1x256xf32> to vector<16x256xf32>
      %44 = arith.addf %42, %43 : vector<16x256xf32>
      %cst_27 = arith.constant 0.000000e+00 : f32
      %45 = vector.broadcast %cst_27 : f32 to vector<16x256xf32>
      %46 = arith.maximumf %44, %45 : vector<16x256xf32>
      %c0_28 = arith.constant 0 : index
      %c0_29 = arith.constant 0 : index
      %47 = vector.load %arg7[%c0_28, %c0_29] : memref<16x256xf32, #tpu.memory_space<vmem>>, vector<16x256xf32>
      tpu.vector_store %arg7[%c0_28, %c0_29], %46 {strides = array<i32>} : memref<16x256xf32, #tpu.memory_space<vmem>>, vector<16x256xf32>,
    } else {
    }
    return
  }
  func.func @transform_0(%arg0: i32, %arg1: i32) -> (i32, i32) {
    %c0_i32 = arith.constant 0 : i32
    %c0_i32_0 = arith.constant 0 : i32
    return %c0_i32, %arg1 : i32, i32
  }
  func.func @transform_1(%arg0: i32, %arg1: i32) -> (i32, i32) {
    %c0_i32 = arith.constant 0 : i32
    return %arg0, %arg1 : i32, i32
  }
  func.func @transform_2(%arg0: i32, %arg1: i32) -> (i32, i32) {
    %c0_i32 = arith.constant 0 : i32
    %c0_i32_0 = arith.constant 0 : i32
    return %c0_i32, %arg0 : i32, i32
  }
  func.func @transform_3(%arg0: i32, %arg1: i32) -> (i32, i32) {
    %c0_i32 = arith.constant 0 : i32
    %c0_i32_0 = arith.constant 0 : i32
    return %c0_i32, %arg0 : i32, i32
  }
  func.func @transform_4(%arg0: i32, %arg1: i32) -> (i32, i32) {
    %c0_i32 = arith.constant 0 : i32
    %c0_i32_0 = arith.constant 0 : i32
    return %c0_i32, %arg0 : i32, i32
  }
  func.func @transform_5(%arg0: i32, %arg1: i32) -> (i32, i32) {
    %c0_i32 = arith.constant 0 : i32
    %c0_i32_0 = arith.constant 0 : i32
    return %c0_i32, %arg0 : i32, i32
  }
}

</mosaic_0001>

<bundles_post_ra>
// kernel: tpu_custom_call.1
= control target key start
LH: loop header
LB: loop body
LE: loop exit
PB: predicated region body
PF: predicated region fallthrough
CT: control target
= control target key end

     0   :  { %10 = vsyncpa [#allocation4], 0  ;;  %s637_s0 = inlined_call_operand.hbm [shape: f32[16,256], index: 0, kind: input, shape index: {}]   ;;  %s638_s1 = inlined_call_operand.hbm [shape: f32[256,256], index: 1, kind: input, shape index: {}]   ;;  %s639_s2 = inlined_call_operand.hbm [shape: f32[1,256], index: 2, kind: input, shape index: {}]   ;;  %s640_s3 = inlined_call_operand.vmem [shape: f32[1,256], index: 3, kind: input, shape index: {}]   ;;  %s641_s4 = inlined_call_operand.hbm [shape: f32[1,256], index: 4, kind: input, shape index: {}]   ;;  %s642_s5 = inlined_call_operand.hbm [shape: f32[16,256], index: 5, kind: output, shape index: {}]  }
   0x1   :  { %11 = vsyncpa [#allocation7], 0 }
   0x2   :  { %12 = vsyncpa [#allocation10], 0 }
   0x3   :  { %13 = vsyncpa [#allocation5], 0  ;;  %s31_s20 = sshll.u32 %s638_s1, 4  ;;  %s549_s21 = smov [#allocation6]   ;;  %s32_s20 = int_to_ptr.hbm [resolvable:$true] %s31_s20 }
   0x4   :  { %s33_s22 = sshll.u32 %s549_s21, 4  ;;  %s18_s25 = sshll.u32 %s637_s0, 4  ;;  %s34_s22 = int_to_ptr.vmem [resolvable:$true] %s33_s22  ;;  %s19_s25 = int_to_ptr.hbm [resolvable:$true] %s18_s25 }
   0x5   :  { %s550_s26 = smov 256   ;;  %s551_s27 = smov 16  }
   0x6   :  { %39 = dma.hbm_to_vmem [thread:$0]  %s32_s20, 8192, %s34_s22, [#allocation7], %s550_s26, %s550_s26, %s551_s27  }
   0x7   :  { %s552_s28 = smov [#allocation3]   ;;  %s45_s1 = sshll.u32 %s639_s2, 4  ;;  %s46_s1 = int_to_ptr.hbm [resolvable:$true] %s45_s1 }
   0x8   :  { %s20_s29 = sshll.u32 %s552_s28, 4  ;;  %s58_s8 = sshll.u32 %s641_s4, 4  ;;  %s21_s29 = int_to_ptr.vmem [resolvable:$true] %s20_s29  ;;  %s59_s8 = int_to_ptr.hbm [resolvable:$true] %s58_s8 }
   0x9   :  { %26 = dma.hbm_to_vmem [thread:$0]  %s19_s25, 512, %s21_s29, [#allocation4], %s550_s26, %s550_s26, %s551_s27  }
   0xa   :  { %s553_s9 = smov [#allocation8]   ;;  %s554_s11 = smov [#allocation9]  }
   0xb   :  { %s47_s10 = sshll.u32 %s553_s9, 4  ;;  %s60_s12 = sshll.u32 %s554_s11, 4  ;;  %s48_s10 = int_to_ptr.vmem [resolvable:$true] %s47_s10  ;;  %s61_s12 = int_to_ptr.vmem [resolvable:$true] %s60_s12 }
   0xc   :  { %50 = dma.hbm_to_vmem [thread:$0]  %s46_s1, 32, %s48_s10, [#allocation7]  }
   0xd   :  { %63 = dma.hbm_to_vmem [thread:$0]  %s59_s8, 32, %s61_s12, [#allocation10]  }
   0xe   :  { %541 = dma.done.wait [#allocation4], 512  }
   0xf   :  { %542 = vsyncadd [#allocation4], 4294966784 }
  0x10   :  { %543 = dma.done.wait [#allocation7], 8224  }
  0x11   :  { %544 = vsyncadd [#allocation7], 4294959072 }
  0x12   :  { %545 = dma.done.wait [#allocation10], 32  }
  0x13   :  { %546 = vsyncadd [#allocation10], 4294967264  ;;  %v126_v0 = vld [vmem:[#allocation6 + $0xf0] sm:$0xff]  ;;  %v127_v1 = vld [vmem:[#allocation6 + $0xf8] sm:$0xff]  ;;  %vm343_vm6 = vcmask 1040384   ;;  %s395_s16 = sshll.u32 %s642_s5, 4  ;;  %s396_s16 = int_to_ptr.hbm [resolvable:$true] %s395_s16 }
  0x14   :  { %v158_v2 = vld [vmem:[#allocation6 + $0x1f0] sm:$0xff]  ;;  %160 = vmatpush.xpose.msra.mxu0 %v126_v0  ;;  %183 = vmatpush.xpose.msra.mxu1 %v127_v1  ;;  %v159_v3 = vld [vmem:[#allocation6 + $0x1f8] sm:$0xff]  ;;  %v124_v4 = vld [vmem:[#allocation6 + $0xe0] sm:$0xff] }
  0x15   :  { %206 = vmatpush.xpose.msra.mxu2 %v158_v2  ;;  %229 = vmatpush.xpose.msra.mxu3 %v159_v3  ;;  %v125_v5 = vld [vmem:[#allocation6 + $0xe8] sm:$0xff]  ;;  %v156_v6 = vld [vmem:[#allocation6 + $0x1e0] sm:$0xff]  ;;  %v122_v8 = vld [vmem:[#allocation6 + $0xd0] sm:$0xff] }
  0x16   :  { %v157_v7 = vld [vmem:[#allocation6 + $0x1e8] sm:$0xff]  ;;  %v123_v9 = vld [vmem:[#allocation6 + $0xd8] sm:$0xff]  ;;  %v154_v10 = vld [vmem:[#allocation6 + $0x1d0] sm:$0xff] }
  0x17   :  { %v155_v11 = vld [vmem:[#allocation6 + $0x1d8] sm:$0xff]  ;;  %v120_v12 = vld [vmem:[#allocation6 + $0xc0] sm:$0xff]  ;;  %v121_v13 = vld [vmem:[#allocation6 + $0xc8] sm:$0xff] }
  0x18   :  { %161 = vmatpush.xpose.msra.mxu0 %v124_v4  ;;  %184 = vmatpush.xpose.msra.mxu1 %v125_v5  ;;  %v152_v14 = vld [vmem:[#allocation6 + $0x1c0] sm:$0xff]  ;;  %v153_v15 = vld [vmem:[#allocation6 + $0x1c8] sm:$0xff]  ;;  %v118_v16 = vld [vmem:[#allocation6 + $0xb0] sm:$0xff] }
  0x19   :  { %207 = vmatpush.xpose.msra.mxu2 %v156_v6  ;;  %230 = vmatpush.xpose.msra.mxu3 %v157_v7  ;;  %v119_v17 = vld [vmem:[#allocation6 + $0xb8] sm:$0xff]  ;;  %v150_v18 = vld [vmem:[#allocation6 + $0x1b0] sm:$0xff]  ;;  %v116_v20 = vld [vmem:[#allocation6 + $0xa0] sm:$0xff] }
  0x1a   :  { %v151_v19 = vld [vmem:[#allocation6 + $0x1b8] sm:$0xff]  ;;  %v117_v21 = vld [vmem:[#allocation6 + $0xa8] sm:$0xff]  ;;  %v148_v22 = vld [vmem:[#allocation6 + $0x1a0] sm:$0xff] }
  0x1b   :  { %v149_v23 = vld [vmem:[#allocation6 + $0x1a8] sm:$0xff]  ;;  %v114_v24 = vld [vmem:[#allocation6 + $0x90] sm:$0xff]  ;;  %v115_v25 = vld [vmem:[#allocation6 + $0x98] sm:$0xff] }
  0x1c   :  { %162 = vmatpush.xpose.msra.mxu0 %v122_v8  ;;  %185 = vmatpush.xpose.msra.mxu1 %v123_v9  ;;  %v146_v26 = vld [vmem:[#allocation6 + $0x190] sm:$0xff]  ;;  %v147_v27 = vld [vmem:[#allocation6 + $0x198] sm:$0xff]  ;;  %v112_v28 = vld [vmem:[#allocation6 + $0x80] sm:$0xff] }
  0x1d   :  { %208 = vmatpush.xpose.msra.mxu2 %v154_v10  ;;  %231 = vmatpush.xpose.msra.mxu3 %v155_v11  ;;  %v113_v29 = vld [vmem:[#allocation6 + $0x88] sm:$0xff]  ;;  %v144_v30 = vld [vmem:[#allocation6 + $0x180] sm:$0xff]  ;;  %v110_v32 = vld [vmem:[#allocation6 + $0x70] sm:$0xff] }
  0x1e   :  { %v145_v31 = vld [vmem:[#allocation6 + $0x188] sm:$0xff]  ;;  %v111_v33 = vld [vmem:[#allocation6 + $0x78] sm:$0xff]  ;;  %v142_v34 = vld [vmem:[#allocation6 + $0x170] sm:$0xff] }
  0x1f   :  { %v143_v35 = vld [vmem:[#allocation6 + $0x178] sm:$0xff]  ;;  %v108_v36 = vld [vmem:[#allocation6 + $0x60] sm:$0xff]  ;;  %v109_v37 = vld [vmem:[#allocation6 + $0x68] sm:$0xff] }
  0x20   :  { %163 = vmatpush.xpose.msra.mxu0 %v120_v12  ;;  %186 = vmatpush.xpose.msra.mxu1 %v121_v13  ;;  %v140_v38 = vld [vmem:[#allocation6 + $0x160] sm:$0xff]  ;;  %v141_v39 = vld [vmem:[#allocation6 + $0x168] sm:$0xff]  ;;  %v106_v40 = vld [vmem:[#allocation6 + $0x50] sm:$0xff] }
  0x21   :  { %209 = vmatpush.xpose.msra.mxu2 %v152_v14  ;;  %232 = vmatpush.xpose.msra.mxu3 %v153_v15  ;;  %v107_v41 = vld [vmem:[#allocation6 + $0x58] sm:$0xff]  ;;  %v138_v42 = vld [vmem:[#allocation6 + $0x150] sm:$0xff]  ;;  %v104_v44 = vld [vmem:[#allocation6 + $0x40] sm:$0xff] }
  0x22   :  { %v139_v43 = vld [vmem:[#allocation6 + $0x158] sm:$0xff]  ;;  %v105_v45 = vld [vmem:[#allocation6 + $0x48] sm:$0xff]  ;;  %v136_v46 = vld [vmem:[#allocation6 + $0x140] sm:$0xff] }
  0x23   :  { %v137_v47 = vld [vmem:[#allocation6 + $0x148] sm:$0xff]  ;;  %v102_v48 = vld [vmem:[#allocation6 + $0x30] sm:$0xff]  ;;  %v103_v49 = vld [vmem:[#allocation6 + $0x38] sm:$0xff] }
  0x24   :  { %164 = vmatpush.xpose.msra.mxu0 %v118_v16  ;;  %187 = vmatpush.xpose.msra.mxu1 %v119_v17  ;;  %v134_v50 = vld [vmem:[#allocation6 + $0x130] sm:$0xff]  ;;  %v135_v51 = vld [vmem:[#allocation6 + $0x138] sm:$0xff]  ;;  %v100_v52 = vld [vmem:[#allocation6 + $0x20] sm:$0xff] }
  0x25   :  { %210 = vmatpush.xpose.msra.mxu2 %v150_v18  ;;  %233 = vmatpush.xpose.msra.mxu3 %v151_v19  ;;  %v101_v53 = vld [vmem:[#allocation6 + $0x28] sm:$0xff]  ;;  %v132_v54 = vld [vmem:[#allocation6 + $0x120] sm:$0xff]  ;;  %v98_v56 = vld [vmem:[#allocation6 + $0x10] sm:$0xff] }
  0x26   :  { %v133_v55 = vld [vmem:[#allocation6 + $0x128] sm:$0xff]  ;;  %v99_v57 = vld [vmem:[#allocation6 + $0x18] sm:$0xff]  ;;  %v130_v58 = vld [vmem:[#allocation6 + $0x110] sm:$0xff] }
  0x27   :  { %v131_v59 = vld [vmem:[#allocation6 + $0x118] sm:$0xff]  ;;  %v96_v60 = vld [vmem:[#allocation6] sm:$0xff]  ;;  %v97_v61 = vld [vmem:[#allocation6 + $0x8] sm:$0xff] }
  0x28   :  { %165 = vmatpush.xpose.msra.mxu0 %v116_v20  ;;  %188 = vmatpush.xpose.msra.mxu1 %v117_v21  ;;  %v128_v62 = vld [vmem:[#allocation6 + $0x100] sm:$0xff]  ;;  %v129_v63 = vld [vmem:[#allocation6 + $0x108] sm:$0xff]  ;;  %v94_v2 = vld [vmem:[#allocation3 + $0x10] sm:$0xff] }
  0x29   :  { %211 = vmatpush.xpose.msra.mxu2 %v148_v22  ;;  %234 = vmatpush.xpose.msra.mxu3 %v149_v23  ;;  %v92_v0 = vld [vmem:[#allocation3] sm:$0xff]  ;;  %v93_v1 = vld [vmem:[#allocation3 + $0x8] sm:$0xff]  ;;  %v95_v3 = vld [vmem:[#allocation3 + $0x18] sm:$0xff] }
  0x2a   :  { %v267_v6 = vld [vmem:[#allocation8] sm:$0x3] }
  0x2b   :  { %v269_v8 = vperm.slane %v267_v6, 0  ;;  %v270_v18 = vperm.slane %v267_v6, 1 }
  0x2c   :  { %166 = vmatpush.xpose.msra.mxu0 %v114_v24  ;;  %189 = vmatpush.xpose.msra.mxu1 %v115_v25 }
  0x2d   :  { %212 = vmatpush.xpose.msra.mxu2 %v146_v26  ;;  %235 = vmatpush.xpose.msra.mxu3 %v147_v27 }
  0x30   :  { %167 = vmatpush.xpose.msra.mxu0 %v112_v28  ;;  %190 = vmatpush.xpose.msra.mxu1 %v113_v29 }
  0x31   :  { %213 = vmatpush.xpose.msra.mxu2 %v144_v30  ;;  %236 = vmatpush.xpose.msra.mxu3 %v145_v31 }
  0x34   :  { %168 = vmatpush.xpose.msra.mxu0 %v110_v32  ;;  %191 = vmatpush.xpose.msra.mxu1 %v111_v33 }
  0x35   :  { %214 = vmatpush.xpose.msra.mxu2 %v142_v34  ;;  %237 = vmatpush.xpose.msra.mxu3 %v143_v35 }
  0x38   :  { %169 = vmatpush.xpose.msra.mxu0 %v108_v36  ;;  %192 = vmatpush.xpose.msra.mxu1 %v109_v37 }
  0x39   :  { %215 = vmatpush.xpose.msra.mxu2 %v140_v38  ;;  %238 = vmatpush.xpose.msra.mxu3 %v141_v39 }
  0x3c   :  { %170 = vmatpush.xpose.msra.mxu0 %v106_v40  ;;  %193 = vmatpush.xpose.msra.mxu1 %v107_v41 }
  0x3d   :  { %216 = vmatpush.xpose.msra.mxu2 %v138_v42  ;;  %239 = vmatpush.xpose.msra.mxu3 %v139_v43 }
  0x40   :  { %171 = vmatpush.xpose.msra.mxu0 %v104_v44  ;;  %194 = vmatpush.xpose.msra.mxu1 %v105_v45 }
  0x41   :  { %217 = vmatpush.xpose.msra.mxu2 %v136_v46  ;;  %240 = vmatpush.xpose.msra.mxu3 %v137_v47 }
  0x44   :  { %172 = vmatpush.xpose.msra.mxu0 %v102_v48  ;;  %195 = vmatpush.xpose.msra.mxu1 %v103_v49 }
  0x45   :  { %218 = vmatpush.xpose.msra.mxu2 %v134_v50  ;;  %241 = vmatpush.xpose.msra.mxu3 %v135_v51 }
  0x48   :  { %173 = vmatpush.xpose.msra.mxu0 %v100_v52  ;;  %196 = vmatpush.xpose.msra.mxu1 %v101_v53 }
  0x49   :  { %219 = vmatpush.xpose.msra.mxu2 %v132_v54  ;;  %242 = vmatpush.xpose.msra.mxu3 %v133_v55 }
  0x4c   :  { %174 = vmatpush.xpose.msra.mxu0 %v98_v56  ;;  %197 = vmatpush.xpose.msra.mxu1 %v99_v57 }
  0x4d   :  { %220 = vmatpush.xpose.msra.mxu2 %v130_v58  ;;  %243 = vmatpush.xpose.msra.mxu3 %v131_v59 }
  0x50   :  { %175 = vmatpush.xpose.msra.mxu0 %v96_v60  ;;  %198 = vmatpush.xpose.msra.mxu1 %v97_v61 }
  0x51   :  { %221 = vmatpush.xpose.msra.mxu2 %v128_v62  ;;  %244 = vmatpush.xpose.msra.mxu3 %v129_v63 }
  0x53   :  { %176 = vmatmul.f32.vlgmr.msra.gmra.mxu0 %v92_v0  ;;  %199 = vmatmul.f32.vlgmr.msra.gmra.mxu1 %v93_v1 }
  0x54   :  { %222 = vmatmul.f32.vlgmr.msra.gmra.mxu2 %v92_v0  ;;  %245 = vmatmul.f32.vlgmr.msra.gmra.mxu3 %v93_v1 }
  0x5b   :  { %179 = vmatmul.f32.gmra.mxu0 %v94_v2  ;;  %202 = vmatmul.f32.gmra.mxu1 %v95_v3 }
  0x5c   :  { %225 = vmatmul.f32.gmra.mxu2 %v94_v2  ;;  %248 = vmatmul.f32.gmra.mxu3 %v95_v3 }
  0xd0   :  { %v177_v4 = vpop.f32.mrf.mxu0  ;;  %v200_v5 = vpop.f32.mrf.mxu1 }
  0xd1   :  { %v201_v7 = vadd.f32 %v200_v5, %v177_v4 }
  0xd3   :  { %v604_v9 = vadd.f32 %v269_v8, %v201_v7 }
  0xd5   :  { %v293_v15 = vmul.f32 %v604_v9, %v604_v9 }
  0xd7   :  { %v223_v10 = vpop.f32.mrf.mxu2  ;;  %v246_v11 = vpop.f32.mrf.mxu3 }
  0xd8   :  { %v180_v12 = vpop.f32.mrf.mxu0  ;;  %v203_v13 = vpop.f32.mrf.mxu1  ;;  %v247_v17 = vadd.f32 %v246_v11, %v223_v10  ;;  %v339_v11 = vld [vmem:[%s640_s3] sm:$0x3]  ;;  %s555_s3 = smov [#allocation11]  }
  0xd9   :  { %v204_v14 = vadd.f32 %v203_v13, %v180_v12  ;;  %v350_v12 = vperm.slane %v339_v11, 1  ;;  %s393_s13 = sshll.u32 %s555_s3, 4  ;;  %s394_s13 = int_to_ptr.vmem [resolvable:$true] %s393_s13 }
  0xda   :  { %v614_v25 = vadd.f32 %v270_v18, %v247_v17 }
  0xdb   :  { %v608_v16 = vadd.f32 %v269_v8, %v204_v14 }
  0xdc   :  { %v294_v32 = vmul.f32 %v614_v25, %v614_v25 }
  0xdd   :  { %v277_v19 = vadd.f32 %v608_v16, %v604_v9  ;;  %v295_v20 = vmul.f32 %v608_v16, %v608_v16 }
  0xdf   :  { %v278_v21 = vrot.slane %v277_v19, 4  ;;  %v297_v22 = vadd.f32 %v295_v20, %v293_v15  ;;  %v226_v23 = vpop.f32.mrf.mxu2  ;;  %v249_v24 = vpop.f32.mrf.mxu3  ;;  %v349_v15 = vperm.slane %v339_v11, 0 }
  0xe0   :  { %v250_v26 = vadd.f32 %v249_v24, %v226_v23 }
  0xe1   :  { %v279_v27 = vadd.f32 %v278_v21, %v277_v19  ;;  %v298_v28 = vrot.slane %v297_v22, 4 }
  0xe2   :  { %v616_v29 = vadd.f32 %v270_v18, %v250_v26  ;;  %v347_v26 = vld [vmem:[#allocation9] sm:$0x3] }
  0xe3   :  { %v280_v30 = vrot.slane %v279_v27, 2  ;;  %v299_v31 = vadd.f32 %v298_v28, %v297_v22 }
  0xe4   :  { %v284_v33 = vadd.f32 %v616_v29, %v614_v25  ;;  %v296_v34 = vmul.f32 %v616_v29, %v616_v29 }
  0xe5   :  { %v281_v35 = vadd.f32 %v280_v30, %v279_v27  ;;  %v300_v36 = vrot.slane %v299_v31, 2 }
  0xe6   :  { %v285_v37 = vrot.slane %v284_v33, 4  ;;  %v304_v38 = vadd.f32 %v296_v34, %v294_v32 }
  0xe7   :  { %v282_v39 = vrot.slane %v281_v35, 1  ;;  %v301_v40 = vadd.f32 %v300_v36, %v299_v31 }
  0xe8   :  { %v286_v41 = vadd.f32 %v285_v37, %v284_v33  ;;  %v305_v42 = vrot.slane %v304_v38, 4 }
  0xe9   :  { %v283_v43 = vadd.f32 %v282_v39, %v281_v35  ;;  %v302_v44 = vrot.slane %v301_v40, 1 }
  0xea   :  { %v287_v45 = vrot.slane %v286_v41, 2  ;;  %v306_v46 = vadd.f32 %v305_v42, %v304_v38 }
  0xeb   :  { %v291_v47 = vmul.f32 0.0625, %v283_v43  ;;  %v303_v48 = vadd.f32 %v302_v44, %v301_v40 }
  0xec   :  { %v288_v49 = vadd.f32 %v287_v45, %v286_v41  ;;  %v307_v50 = vrot.slane %v306_v46, 2 }
  0xed   :  { %v311_v51 = vmul.f32 0.0625, %v303_v48  ;;  %v313_v52 = vmul.f32 %v291_v47, %v291_v47  ;;  %v353_v22 = vmul.f32 %v349_v15, %v291_v47 }
  0xee   :  { %v289_v53 = vrot.slane %v288_v49, 1  ;;  %v308_v54 = vadd.f32 %v307_v50, %v306_v46 }
  0xef   :  { %v315_v55 = vsub.f32 %v311_v51, %v313_v52 }
  0xf0   :  { %v290_v56 = vadd.f32 %v289_v53, %v288_v49  ;;  %v309_v57 = vrot.slane %v308_v54, 1 }
  0xf1   :  { %v317_v58 = vadd.f32 1e-05, %v315_v55 }
  0xf2   :  { %v292_v59 = vmul.f32 0.0625, %v290_v56  ;;  %v310_v60 = vadd.f32 %v309_v57, %v308_v54 }
  0xf3   :  { %417 = vrsqrt.f32 %v317_v58  ;;  %vm325_vm2 = vweird.f32 %v317_v58 }
  0xf4   :  { %v312_v61 = vmul.f32 0.0625, %v310_v60  ;;  %v314_v62 = vmul.f32 %v292_v59, %v292_v59  ;;  %v354_v18 = vmul.f32 %v350_v12, %v292_v59 }
  0xf6   :  { %v316_v63 = vsub.f32 %v312_v61, %v314_v62 }
  0xf8   :  { %v318_v0 = vadd.f32 1e-05, %v316_v63 }
  0xf9   :  { %v418_v1 = vpop.eup %417 }
  0xfa   :  { %v320_v2 = vmul.f32 %v418_v1, %v317_v58  ;;  %419 = vrsqrt.f32 %v318_v0  ;;  %vm326_vm0 = vweird.f32 %v418_v1  ;;  %vm335_vm4 = vweird.f32 %v318_v0 }
  0xfb   :  { %vm327_vm3 = vmor %vm325_vm2, %vm326_vm0 }
  0xfc   :  { %v321_v3 = vmul.f32 %v418_v1, %v320_v2 }
  0xfe   :  { %v322_v4 = vmul.f32 0.5, %v321_v3 }
 0x100   :  { %v420_v5 = vpop.eup %419  ;;  %v323_v7 = vsub.f32 1.5, %v322_v4 }
 0x101   :  { %v330_v6 = vmul.f32 %v420_v5, %v318_v0  ;;  %vm336_vm1 = vweird.f32 %v420_v5 }
 0x102   :  { %v324_v13 = vmul.f32 %v418_v1, %v323_v7  ;;  %vm337_vm5 = vmor %vm335_vm4, %vm336_vm1 }
 0x103   :  { %v331_v8 = vmul.f32 %v420_v5, %v330_v6 }
 0x104   :  { %v328_v19 = vsel %vm327_vm3, %v418_v1, %v324_v13 }
 0x105   :  { %v332_v10 = vmul.f32 0.5, %v331_v8  ;;  %v355_v27 = vmul.f32 %v353_v22, %v328_v19 }
 0x107   :  { %v333_v14 = vsub.f32 1.5, %v332_v10 }
 0x109   :  { %v334_v17 = vmul.f32 %v420_v5, %v333_v14 }
 0x10b   :  { %v338_v20 = vsel %vm337_vm5, %v420_v5, %v334_v17 }
 0x10c   :  { %v342_v21 = vrot.slane %v338_v20, 7  ;;  %v356_v23 = vmul.f32 %v354_v18, %v338_v20 }
 0x10e   :  { %v344_v24 = vsel %vm343_vm6, %v328_v19, %v342_v21  ;;  %v359_v28 = vrot.slane %v356_v23, 7 }
 0x10f   :  { %v346_v30 = vmul.f32 %v344_v24, %v339_v11 }
 0x110   :  { %v360_v31 = vsel %vm343_vm6, %v355_v27, %v359_v28 }
 0x111   :  { %v362_v32 = vsub.f32 %v347_v26, %v360_v31  ;;  %v364_v33 = vperm.slane %v346_v30, 0  ;;  %v365_v34 = vperm.slane %v346_v30, 1 }
 0x113   :  { %v368_v35 = vmul.f32 %v364_v33, %v604_v9  ;;  %v369_v36 = vmul.f32 %v365_v34, %v614_v25  ;;  %v370_v37 = vmul.f32 %v364_v33, %v608_v16  ;;  %v371_v38 = vmul.f32 %v365_v34, %v616_v29 }
 0x114   :  { %v373_v39 = vperm.slane %v362_v32, 0  ;;  %v374_v40 = vperm.slane %v362_v32, 1 }
 0x116   :  { %v378_v41 = vadd.f32 %v374_v40, %v369_v36  ;;  %v380_v42 = vadd.f32 %v374_v40, %v371_v38  ;;  %v377_v43 = vadd.f32 %v373_v39, %v368_v35  ;;  %v379_v44 = vadd.f32 %v373_v39, %v370_v37 }
 0x118   :  { %v382_v45 = vmax.f32 %v378_v41, 0.0  ;;  %v384_v46 = vmax.f32 %v380_v42, 0.0  ;;  %v381_v47 = vmax.f32 %v377_v43, 0.0  ;;  %v383_v9 = vmax.f32 %v379_v44, 0.0 }
 0x11a   :  { %388 = vst [vmem:[#allocation11 + $0x18] sm:$0xff] %v384_v46 }
 0x11b   :  { %386 = vst [vmem:[#allocation11 + $0x8] sm:$0xff] %v382_v45 }
 0x11c   :  { %385 = vst [vmem:[#allocation11] sm:$0xff] %v381_v47 }
 0x11d   :  { %387 = vst [vmem:[#allocation11 + $0x10] sm:$0xff] %v383_v9 }
 0x11e   :  { %401 = dma.vmem_to_hbm [thread:$0]  %s394_s13, 512, %s396_s16, [#allocation5], %s550_s26, %s550_s26, %s551_s27  }
 0x11f   :  { %547 = dma.done.wait [#allocation5], 512  }
 0x120   :  { %548 = vsyncadd [#allocation5], 4294966784 }
 0x121   :  { %406 = vsyncpa [#allocation4], 1 }
 0x122   :  { %407 = vsyncpa [#allocation7], 1 }
 0x123   :  { %408 = vsyncpa [#allocation10], 1 }
 0x124   :  { %409 = vsyncpa [#allocation5], 1 }

</bundles_post_ra>
